<compile_context>
chip_gen: v7x
topology: tpu7x:2x2x1
jax: 0.10.0
libtpu: 0.0.40
codegen_flags: <defaults>
</compile_context>

<pallas_src>
import math
from functools import reduce

import numpy as np
import jax
import jax.numpy as jnp
from jax.experimental import pallas as pl
from jax.experimental.pallas import tpu as pltpu

_LANE = 128


# ---------------------------------------------------------------------------
# Pure-python re-implementation of the e3nn Rs bookkeeping (no torch).
# ---------------------------------------------------------------------------
def convention(Rs):
    out = []
    for r in Rs:
        if isinstance(r, int):
            mul, l, p = 1, r, 0
        elif len(r) == 2:
            (mul, l), p = r, 0
        else:
            mul, l, p = r
        assert isinstance(mul, int) and mul >= 0
        assert isinstance(l, int) and l >= 0
        assert p in [0, 1, -1]
        out.append((mul, l, p))
    return out


def simplify(Rs):
    out = []
    for mul, l, p in convention(Rs):
        if out and out[-1][1:] == (l, p):
            out[-1] = (out[-1][0] + mul, l, p)
        elif mul > 0:
            out.append((mul, l, p))
    return out


def dim(Rs):
    return sum(mul * (2 * l + 1) for mul, l, p in convention(Rs))


def sort_rs(Rs):
    """Return (Rs_sorted, perm) with sorted[i] = unsorted[perm[i]]."""
    Rs_in = simplify(Rs)
    xs = []
    j = 0
    for mul, l, p in Rs_in:
        d = mul * (2 * l + 1)
        xs.append((l, p, mul, j, d))
        j += d
    Rs_out = []
    perm = []
    for l, p, mul, j, d in sorted(xs):
        Rs_out.append((mul, l, p))
        perm.extend(range(j, j + d))
    return Rs_out, np.asarray(perm, dtype=np.int64)


def transpose_mul(Rs, cmul=-1):
    Rs = simplify(Rs)
    muls = {mul for mul, _, _ in Rs}
    if cmul == -1:
        cmul = reduce(math.gcd, muls)
    assert all(mul % cmul == 0 for mul, _, _ in Rs)
    return cmul, [(mul // cmul, l, p) for mul, l, p in Rs]


def permutation_indices(Rs_in, Rs_out):
    """Static gather indices `src` such that out[i] = in[src[i]].

    Exactly equivalent to the original dense mixing matrix M = b.T @ a
    (M[i, src[i]] = 1, out = M @ in), but kept as indices: no NxN matrix,
    no O(B*N^2) FLOPs.
    """
    Rs_in_s, a = sort_rs(Rs_in)
    Rs_out_s, b = sort_rs(Rs_out)
    assert simplify(Rs_in_s) == simplify(Rs_out_s)
    n = a.shape[0]
    src = np.empty(n, dtype=np.int64)
    src[b] = a
    return src


def compress_runs(src):
    """Compress the permutation into maximal contiguous (dst, src, len) runs.

    The runs cover dst = 0..N-1 in order, so every output row is written.
    For Rs = mul x [(1,l0),(1,l1),...] this yields mul * n_l runs.
    """
    runs = []
    start = 0
    n = len(src)
    for i in range(1, n + 1):
        if i == n or int(src[i]) != int(src[i - 1]) + 1:
            runs.append((int(start), int(src[start]), int(i - start)))
            start = i
    return tuple(runs)


# ---------------------------------------------------------------------------
# Pallas kernel: lane-dense permutation of the sublane (channel) axis.
# Tile layout is [N, TB]: channels on sublanes, batch on lanes.
# ---------------------------------------------------------------------------
def _make_perm_kernel(runs):
    def kernel(x_ref, o_ref):
        # Static, fully-unrolled contiguous block copies. Each copy is a
        # lane-dense (length, TB) load + store; no MXU, no masked lane stores.
        for dst, src, length in runs:
            o_ref[pl.ds(dst, length), :] = x_ref[pl.ds(src, length), :]
    return kernel


def _choose_tile_b(B, N, itemsize):
    # Budget: 2x double-buffered input tiles + 2x output tiles <= 8 MiB,
    # comfortably inside scoped VMEM on every generation
    # (v5e default 16 MiB, v6e 32 MiB, v7x 32 MiB scoped / 64 MiB physical).
    budget = 8 * 1024 * 1024
    max_tb = budget // (4 * N * itemsize)
    max_tb = max(_LANE, (max_tb // _LANE) * _LANE)
    tb = min(2048, max_tb)
    if B <= tb:
        return B      # single block: block dim == full array dim -> always legal
    return tb         # multiple of 128: legal and lane-dense


def apply_permutation_pallas(x, runs, *, tile_b=None):
    """x: [B, N]. Returns x[:, src] computed by a Pallas TPU kernel.

    Operates on the transposed [N, B] layout so the (potentially large) batch
    axis sits on the 128-lane axis: all vector loads/stores are lane-dense,
    and the permutation is a few static sublane-block copies. The batch axis
    is tiled ("parallel" grid -> shards across v7x's two TensorCores).
    """
    B, N = x.shape
    xt = x.T                                     # [N, B] layout plumbing
    TB = tile_b if tile_b is not None else _choose_tile_b(B, N, x.dtype.itemsize)
    grid = (pl.cdiv(B, TB),)
    itemsize = x.dtype.itemsize

    yt = pl.pallas_call(
        _make_perm_kernel(runs),
        out_shape=jax.ShapeDtypeStruct((N, B), x.dtype),
        grid=grid,
        in_specs=[pl.BlockSpec((N, TB), lambda i: (0, i))],
        out_specs=pl.BlockSpec((N, TB), lambda i: (0, i)),
        compiler_params=pltpu.CompilerParams(
            dimension_semantics=("parallel",),   # batch tiles are independent
        ),
        cost_estimate=pl.CostEstimate(
            flops=0,
            transcendentals=0,
            bytes_accessed=2 * B * N * itemsize,
        ),
    )(xt)
    return yt.T


# ---------------------------------------------------------------------------
# Module-equivalent wrapper.
# ---------------------------------------------------------------------------
class TransposeToMulL:
    """[(mul, 1), (mul, 2)] -> mul * [(1, 1), (1, 2)]
       [batch, l * mul * m] -> [batch, mul, l * m]"""

    def __init__(self, Rs):
        self.Rs_in = convention(Rs)
        self.mul, self.Rs_out = transpose_mul(self.Rs_in)
        # Deterministic "parameter": a fixed permutation of the channel axis
        # (replaces the original dense NxN mixing matrix).
        self.src = permutation_indices(self.Rs_in, self.mul * self.Rs_out)
        self.runs = compress_runs(self.src)

    def __call__(self, features):
        *size, n = features.shape
        x = features.reshape(-1, n)
        y = apply_permutation_pallas(x, self.runs)
        return y.reshape(*size, self.mul, -1)


# ---------------------------------------------------------------------------
if __name__ == "__main__":
    # Rs = [(4, 0), (4, 1), (4, 2)] -> n = 4*1 + 4*3 + 4*5 = 36, mul = 4
    Rs = [(4, 0), (4, 1), (4, 2)]
    mod = TransposeToMulL(Rs)
    n = dim(Rs)

    key = jax.random.PRNGKey(0)
    feats = jax.random.normal(key, (2, 3, n), dtype=jnp.float32)

    out = jax.block_until_ready(mod(feats))
    assert out.shape == (2, 3, mod.mul, n // mod.mul), out.shape

    # Reference 1: static permutation of the last dim.
    x_np = np.asarray(feats)
    ref = x_np[..., mod.src].reshape(2, 3, mod.mul, -1)
    np.testing.assert_allclose(np.asarray(out), ref, rtol=0, atol=0)

    # Reference 2: original dense mixing-matrix semantics (M @ x.T).T.
    M = np.zeros((n, n), dtype=np.float32)
    M[np.arange(n), mod.src] = 1.0
    ref2 = (x_np.reshape(-1, n) @ M.T).reshape(2, 3, mod.mul, -1)
    np.testing.assert_allclose(ref, ref2, rtol=0, atol=0)

    # Exercise the multi-tile (grid > 1) batch-tiled path explicitly.
    x2 = jax.random.normal(jax.random.PRNGKey(0), (256, n), dtype=jnp.float32)
    out2 = jax.block_until_ready(
        apply_permutation_pallas(x2, mod.runs, tile_b=128))
    np.testing.assert_allclose(np.asarray(out2), np.asarray(x2)[:, mod.src],
                               rtol=0, atol=0)

    print("KERNEL_OK")
</pallas_src>

<mosaic_0001>
module attributes {stable_mosaic.version = 11 : i64} {
  func.func @kernel(%arg0: i32, %arg1: memref<36x6xf32, #tpu.memory_space<vmem>>, %arg2: memref<36x6xf32, #tpu.memory_space<vmem>>) attributes {dimension_semantics = [#tpu.dimension_semantics<parallel>], iteration_bounds = array<i64: 1>, scalar_prefetch = 0 : i64, scratch_operands = 0 : i64, tpu.core_type = #tpu.core_type<tc>, window_params = [{transform_indices = @transform_0, window_bounds = array<i64: 36, 6>}, {transform_indices = @transform_1, window_bounds = array<i64: 36, 6>}]} {
    %c0 = arith.constant 0 : index
    %c0_0 = arith.constant 0 : index
    %0 = vector.load %arg1[%c0, %c0_0] : memref<36x6xf32, #tpu.memory_space<vmem>>, vector<1x6xf32>
    %c0_1 = arith.constant 0 : index
    %c0_2 = arith.constant 0 : index
    %1 = vector.load %arg2[%c0_1, %c0_2] : memref<36x6xf32, #tpu.memory_space<vmem>>, vector<1x6xf32>
    tpu.vector_store %arg2[%c0_1, %c0_2], %0 {strides = array<i32>} : memref<36x6xf32, #tpu.memory_space<vmem>>, vector<1x6xf32>,
    %c4 = arith.constant 4 : index
    %c0_3 = arith.constant 0 : index
    %2 = vector.load %arg1[%c4, %c0_3] : memref<36x6xf32, #tpu.memory_space<vmem>>, vector<3x6xf32>
    %c1 = arith.constant 1 : index
    %c0_4 = arith.constant 0 : index
    %3 = vector.load %arg2[%c1, %c0_4] : memref<36x6xf32, #tpu.memory_space<vmem>>, vector<3x6xf32>
    tpu.vector_store %arg2[%c1, %c0_4], %2 {strides = array<i32>} : memref<36x6xf32, #tpu.memory_space<vmem>>, vector<3x6xf32>,
    %c16 = arith.constant 16 : index
    %c0_5 = arith.constant 0 : index
    %4 = vector.load %arg1[%c16, %c0_5] : memref<36x6xf32, #tpu.memory_space<vmem>>, vector<5x6xf32>
    %c4_6 = arith.constant 4 : index
    %c0_7 = arith.constant 0 : index
    %5 = vector.load %arg2[%c4_6, %c0_7] : memref<36x6xf32, #tpu.memory_space<vmem>>, vector<5x6xf32>
    tpu.vector_store %arg2[%c4_6, %c0_7], %4 {strides = array<i32>} : memref<36x6xf32, #tpu.memory_space<vmem>>, vector<5x6xf32>,
    %c1_8 = arith.constant 1 : index
    %c0_9 = arith.constant 0 : index
    %6 = vector.load %arg1[%c1_8, %c0_9] : memref<36x6xf32, #tpu.memory_space<vmem>>, vector<1x6xf32>
    %c9 = arith.constant 9 : index
    %c0_10 = arith.constant 0 : index
    %7 = vector.load %arg2[%c9, %c0_10] : memref<36x6xf32, #tpu.memory_space<vmem>>, vector<1x6xf32>
    tpu.vector_store %arg2[%c9, %c0_10], %6 {strides = array<i32>} : memref<36x6xf32, #tpu.memory_space<vmem>>, vector<1x6xf32>,
    %c7 = arith.constant 7 : index
    %c0_11 = arith.constant 0 : index
    %8 = vector.load %arg1[%c7, %c0_11] : memref<36x6xf32, #tpu.memory_space<vmem>>, vector<3x6xf32>
    %c10 = arith.constant 10 : index
    %c0_12 = arith.constant 0 : index
    %9 = vector.load %arg2[%c10, %c0_12] : memref<36x6xf32, #tpu.memory_space<vmem>>, vector<3x6xf32>
    tpu.vector_store %arg2[%c10, %c0_12], %8 {strides = array<i32>} : memref<36x6xf32, #tpu.memory_space<vmem>>, vector<3x6xf32>,
    %c21 = arith.constant 21 : index
    %c0_13 = arith.constant 0 : index
    %10 = vector.load %arg1[%c21, %c0_13] : memref<36x6xf32, #tpu.memory_space<vmem>>, vector<5x6xf32>
    %c13 = arith.constant 13 : index
    %c0_14 = arith.constant 0 : index
    %11 = vector.load %arg2[%c13, %c0_14] : memref<36x6xf32, #tpu.memory_space<vmem>>, vector<5x6xf32>
    tpu.vector_store %arg2[%c13, %c0_14], %10 {strides = array<i32>} : memref<36x6xf32, #tpu.memory_space<vmem>>, vector<5x6xf32>,
    %c2 = arith.constant 2 : index
    %c0_15 = arith.constant 0 : index
    %12 = vector.load %arg1[%c2, %c0_15] : memref<36x6xf32, #tpu.memory_space<vmem>>, vector<1x6xf32>
    %c18 = arith.constant 18 : index
    %c0_16 = arith.constant 0 : index
    %13 = vector.load %arg2[%c18, %c0_16] : memref<36x6xf32, #tpu.memory_space<vmem>>, vector<1x6xf32>
    tpu.vector_store %arg2[%c18, %c0_16], %12 {strides = array<i32>} : memref<36x6xf32, #tpu.memory_space<vmem>>, vector<1x6xf32>,
    %c10_17 = arith.constant 10 : index
    %c0_18 = arith.constant 0 : index
    %14 = vector.load %arg1[%c10_17, %c0_18] : memref<36x6xf32, #tpu.memory_space<vmem>>, vector<3x6xf32>
    %c19 = arith.constant 19 : index
    %c0_19 = arith.constant 0 : index
    %15 = vector.load %arg2[%c19, %c0_19] : memref<36x6xf32, #tpu.memory_space<vmem>>, vector<3x6xf32>
    tpu.vector_store %arg2[%c19, %c0_19], %14 {strides = array<i32>} : memref<36x6xf32, #tpu.memory_space<vmem>>, vector<3x6xf32>,
    %c26 = arith.constant 26 : index
    %c0_20 = arith.constant 0 : index
    %16 = vector.load %arg1[%c26, %c0_20] : memref<36x6xf32, #tpu.memory_space<vmem>>, vector<5x6xf32>
    %c22 = arith.constant 22 : index
    %c0_21 = arith.constant 0 : index
    %17 = vector.load %arg2[%c22, %c0_21] : memref<36x6xf32, #tpu.memory_space<vmem>>, vector<5x6xf32>
    tpu.vector_store %arg2[%c22, %c0_21], %16 {strides = array<i32>} : memref<36x6xf32, #tpu.memory_space<vmem>>, vector<5x6xf32>,
    %c3 = arith.constant 3 : index
    %c0_22 = arith.constant 0 : index
    %18 = vector.load %arg1[%c3, %c0_22] : memref<36x6xf32, #tpu.memory_space<vmem>>, vector<1x6xf32>
    %c27 = arith.constant 27 : index
    %c0_23 = arith.constant 0 : index
    %19 = vector.load %arg2[%c27, %c0_23] : memref<36x6xf32, #tpu.memory_space<vmem>>, vector<1x6xf32>
    tpu.vector_store %arg2[%c27, %c0_23], %18 {strides = array<i32>} : memref<36x6xf32, #tpu.memory_space<vmem>>, vector<1x6xf32>,
    %c13_24 = arith.constant 13 : index
    %c0_25 = arith.constant 0 : index
    %20 = vector.load %arg1[%c13_24, %c0_25] : memref<36x6xf32, #tpu.memory_space<vmem>>, vector<3x6xf32>
    %c28 = arith.constant 28 : index
    %c0_26 = arith.constant 0 : index
    %21 = vector.load %arg2[%c28, %c0_26] : memref<36x6xf32, #tpu.memory_space<vmem>>, vector<3x6xf32>
    tpu.vector_store %arg2[%c28, %c0_26], %20 {strides = array<i32>} : memref<36x6xf32, #tpu.memory_space<vmem>>, vector<3x6xf32>,
    %c31 = arith.constant 31 : index
    %c0_27 = arith.constant 0 : index
    %22 = vector.load %arg1[%c31, %c0_27] : memref<36x6xf32, #tpu.memory_space<vmem>>, vector<5x6xf32>
    %c31_28 = arith.constant 31 : index
    %c0_29 = arith.constant 0 : index
    %23 = vector.load %arg2[%c31_28, %c0_29] : memref<36x6xf32, #tpu.memory_space<vmem>>, vector<5x6xf32>
    tpu.vector_store %arg2[%c31_28, %c0_29], %22 {strides = array<i32>} : memref<36x6xf32, #tpu.memory_space<vmem>>, vector<5x6xf32>,
    return
  }
  func.func @transform_0(%arg0: i32) -> (i32, i32) {
    %c0_i32 = arith.constant 0 : i32
    %c0_i32_0 = arith.constant 0 : i32
    return %c0_i32, %arg0 : i32, i32
  }
  func.func @transform_1(%arg0: i32) -> (i32, i32) {
    %c0_i32 = arith.constant 0 : i32
    %c0_i32_0 = arith.constant 0 : i32
    return %c0_i32, %arg0 : i32, i32
  }
}

</mosaic_0001>

<bundles_post_ra>
// kernel: tpu_custom_call.1
= control target key start
LH: loop header
LB: loop body
LE: loop exit
PB: predicated region body
PF: predicated region fallthrough
CT: control target
= control target key end

     0   :  { %vm9_vm0 = vcmask 40960   ;;  %vm12_vm1 = vcmask 43008   ;;  %vm15_vm2 = vcmask 45056   ;;  %s133_s0 = inlined_call_operand.vmem [shape: f32[36,6], index: 0, kind: input, shape index: {}]   ;;  %s134_s1 = inlined_call_operand.vmem [shape: f32[36,6], index: 1, kind: output, shape index: {}]  }
   0x1   :  { %v8_v0 = vld [vmem:[%s133_s0] sm:$0x1]  ;;  %v11_v1 = vld [vmem:[%s133_s0 + $0x4] sm:$0x7]  ;;  %v14_v2 = vld [vmem:[%s133_s0 + $0x10] sm:$0x1f] }
   0x2   :  { %10 = vst.msk [vmem:[%s134_s1] sm:$0x1] %vm9_vm0, %v8_v0  ;;  %v17_v3 = vld [vmem:[%s133_s0 + $0x1] sm:$0x1]  ;;  %v19_v4 = vld [vmem:[%s133_s0 + $0x7] sm:$0x7] }
   0x3   :  { %13 = vst.msk [vmem:[%s134_s1 + $0x1] sm:$0x7] %vm12_vm1, %v11_v1  ;;  %v21_v5 = vld [vmem:[%s133_s0 + $0x15] sm:$0x1f]  ;;  %20 = vst.msk [vmem:[%s134_s1 + $0xa] sm:$0x7] %vm12_vm1, %v19_v4 }
   0x4   :  { %16 = vst.msk [vmem:[%s134_s1 + $0x4] sm:$0x1f] %vm15_vm2, %v14_v2  ;;  %22 = vst.msk [vmem:[%s134_s1 + $0xd] sm:$0x1f] %vm15_vm2, %v21_v5  ;;  %v23_v6 = vld [vmem:[%s133_s0 + $0x2] sm:$0x1] }
   0x5   :  { %18 = vst.msk [vmem:[%s134_s1 + $0x9] sm:$0x1] %vm9_vm0, %v17_v3  ;;  %v25_v7 = vld [vmem:[%s133_s0 + $0xa] sm:$0x7]  ;;  %v27_v8 = vld [vmem:[%s133_s0 + $0x1a] sm:$0x1f] }
   0x6   :  { %24 = vst.msk [vmem:[%s134_s1 + $0x12] sm:$0x1] %vm9_vm0, %v23_v6  ;;  %v29_v9 = vld [vmem:[%s133_s0 + $0x3] sm:$0x1]  ;;  %v31_v10 = vld [vmem:[%s133_s0 + $0xd] sm:$0x7] }
   0x7   :  { %26 = vst.msk [vmem:[%s134_s1 + $0x13] sm:$0x7] %vm12_vm1, %v25_v7  ;;  %v33_v11 = vld [vmem:[%s133_s0 + $0x1f] sm:$0x1f]  ;;  %32 = vst.msk [vmem:[%s134_s1 + $0x1c] sm:$0x7] %vm12_vm1, %v31_v10 }
   0x8   :  { %28 = vst.msk [vmem:[%s134_s1 + $0x16] sm:$0x1f] %vm15_vm2, %v27_v8  ;;  %34 = vst.msk [vmem:[%s134_s1 + $0x1f] sm:$0x1f] %vm15_vm2, %v33_v11 }
   0x9   :  { %30 = vst.msk [vmem:[%s134_s1 + $0x1b] sm:$0x1] %vm9_vm0, %v29_v9 }

</bundles_post_ra>
